<compile_context>
chip_gen: v7x
topology: tpu7x:2x2x1
jax: 0.10.0
libtpu: 0.0.40
codegen_flags: <defaults>
</compile_context>

<pallas_src>
import jax
import jax.numpy as jnp
from jax import lax
from jax.experimental import pallas as pl
from jax.experimental.pallas import tpu as pltpu


def _linear_kernel(x_ref, w_ref, b_ref, o_ref):
    # x_ref: [TILE_M, S] (compute dtype, e.g. bf16)
    # w_ref: [G, S]      (compute dtype, native PyTorch layout, VMEM-resident)
    # b_ref: [1, G]      (f32)
    # o_ref: [TILE_M, G] (f32 logits)
    acc = lax.dot_general(
        x_ref[...], w_ref[...],
        dimension_numbers=(((1,), (1,)), ((), ())),   # contract S with S
        preferred_element_type=jnp.float32,           # f32 MXU accumulation
    )
    o_ref[...] = (acc + b_ref[...]).astype(o_ref.dtype)


def logistic_regression_forward(x, weight, bias, *, tile_m=2048,
                                compute_dtype=jnp.bfloat16):
    """Forward pass equivalent to torch.nn.Linear(num_sensors, num_gestures).

    Args:
        x:      [batch, num_sensors] float32
        weight: [num_gestures, num_sensors] float32 (PyTorch layout, NOT transposed)
        bias:   [num_gestures] float32
        tile_m: batch rows per grid step (rounded to a multiple of 8).
        compute_dtype: matmul input dtype (bf16 halves the dominant x HBM read).
    Returns:
        [batch, num_gestures] float32 logits
    """
    batch, num_sensors = x.shape
    num_gestures, _ = weight.shape

    # Round the batch tile to sublane granularity (8) and clamp to the batch.
    tile_m = max(8, ((min(tile_m, batch) + 7) // 8) * 8)
    # Pad batch so every grid step writes full tiles (partial rows sliced off
    # after the call; zero-padded rows are never returned).
    padded = pl.cdiv(batch, tile_m) * tile_m
    if padded != batch:
        x = jnp.pad(x, ((0, padded - batch), (0, 0)))

    x_c = x.astype(compute_dtype)
    w_c = weight.astype(compute_dtype)                 # keep native [G, S]
    b2d = bias.astype(jnp.float32).reshape(1, num_gestures)

    grid = (padded // tile_m,)

    bytes_accessed = (
        x_c.size * x_c.dtype.itemsize
        + w_c.size * w_c.dtype.itemsize
        + b2d.size * 4
        + padded * num_gestures * 4
    )

    out = pl.pallas_call(
        _linear_kernel,
        out_shape=jax.ShapeDtypeStruct((padded, num_gestures), jnp.float32),
        grid=grid,
        in_specs=[
            # x: tiled along batch -> double-buffered DMA overlaps the matmul.
            pl.BlockSpec((tile_m, num_sensors), lambda i: (i, 0)),
            # weight / bias: constant index map -> stays resident in VMEM.
            pl.BlockSpec((num_gestures, num_sensors), lambda i: (0, 0)),
            pl.BlockSpec((1, num_gestures), lambda i: (0, 0)),
        ],
        out_specs=pl.BlockSpec((tile_m, num_gestures), lambda i: (i, 0)),
        compiler_params=pltpu.CompilerParams(
            # Embarrassingly parallel over batch: lets v7x use both TCs.
            dimension_semantics=("parallel",),
        ),
        cost_estimate=pl.CostEstimate(
            flops=2 * padded * num_sensors * num_gestures,
            transcendentals=0,
            bytes_accessed=bytes_accessed,
        ),
    )(x_c, w_c, b2d)

    if padded != batch:
        out = out[:batch]
    return out
    # TODO(synk): if the deployment batch is tiny (~8 rows), plain XLA
    # `x @ weight.T + bias` beats the pallas_call launch overhead.


if __name__ == "__main__":
    # Small shapes consistent with the module (sensor readings -> gestures).
    batch = 256
    num_sensors = 32
    num_gestures = 16

    key = jax.random.PRNGKey(0)
    kx, kw, kb = jax.random.split(key, 3)

    # Mimic torch.nn.Linear init: U(-1/sqrt(fan_in), 1/sqrt(fan_in)).
    bound = 1.0 / (num_sensors ** 0.5)
    weight = jax.random.uniform(
        kw, (num_gestures, num_sensors), jnp.float32, minval=-bound, maxval=bound
    )
    bias = jax.random.uniform(
        kb, (num_gestures,), jnp.float32, minval=-bound, maxval=bound
    )
    x = jax.random.normal(kx, (batch, num_sensors), jnp.float32)

    # tile_m=64 here just to exercise a multi-step (grid=(4,)) pipeline at a
    # small demo batch; in production the default 2048-row tile applies.
    out = logistic_regression_forward(x, weight, bias, tile_m=64)
    out = jax.block_until_ready(out)
    assert out.shape == (batch, num_gestures)

    # Tight check against a plain-JAX reference with identical bf16 inputs
    # (both paths accumulate in f32 on the MXU).
    x_b = x.astype(jnp.bfloat16)
    w_b = weight.astype(jnp.bfloat16)
    ref_bf16 = lax.dot_general(
        x_b, w_b, (((1,), (1,)), ((), ())), preferred_element_type=jnp.float32
    ) + bias
    assert jnp.allclose(out, ref_bf16, atol=1e-4, rtol=1e-4)

    # Looser sanity check against the full-f32 reference (bf16 input rounding).
    ref_f32 = x @ weight.T + bias
    assert jnp.allclose(out, ref_f32, atol=5e-2, rtol=5e-2)

    print("KERNEL_OK")
</pallas_src>

<mosaic_0001>
module attributes {stable_mosaic.version = 11 : i64} {
  func.func @_linear_kernel(%arg0: i32, %arg1: memref<64x32xbf16, #tpu.memory_space<vmem>>, %arg2: memref<16x32xbf16, #tpu.memory_space<vmem>>, %arg3: memref<1x16xf32, #tpu.memory_space<vmem>>, %arg4: memref<64x16xf32, #tpu.memory_space<vmem>>) attributes {dimension_semantics = [#tpu.dimension_semantics<parallel>], iteration_bounds = array<i64: 4>, scalar_prefetch = 0 : i64, scratch_operands = 0 : i64, tpu.core_type = #tpu.core_type<tc>, window_params = [{transform_indices = @transform_0, window_bounds = array<i64: 64, 32>}, {pipeline_mode = #tpu.pipeline_mode<synchronous>, transform_indices = @transform_1, window_bounds = array<i64: 16, 32>}, {pipeline_mode = #tpu.pipeline_mode<synchronous>, transform_indices = @transform_2, window_bounds = array<i64: 1, 16>}, {transform_indices = @transform_3, window_bounds = array<i64: 64, 16>}]} {
    %c0 = arith.constant 0 : index
    %c0_0 = arith.constant 0 : index
    %0 = vector.load %arg1[%c0, %c0_0] : memref<64x32xbf16, #tpu.memory_space<vmem>>, vector<64x32xbf16>
    %c0_1 = arith.constant 0 : index
    %c0_2 = arith.constant 0 : index
    %1 = vector.load %arg2[%c0_1, %c0_2] : memref<16x32xbf16, #tpu.memory_space<vmem>>, vector<16x32xbf16>
    %cst = arith.constant dense<0.000000e+00> : vector<64x16xf32>
    %2 = tpu.matmul %0, %1, %cst {dimension_numbers = #tpu.dot_dimension_numbers<[1], [1], [0], [0], [0, 0, 1, 0], [], []>} : vector<64x32xbf16>, vector<16x32xbf16>, vector<64x16xf32> -> vector<64x16xf32>
    %c0_3 = arith.constant 0 : index
    %c0_4 = arith.constant 0 : index
    %3 = vector.load %arg3[%c0_3, %c0_4] : memref<1x16xf32, #tpu.memory_space<vmem>>, vector<1x16xf32>
    %4 = vector.broadcast %3 : vector<1x16xf32> to vector<64x16xf32>
    %5 = arith.addf %2, %4 : vector<64x16xf32>
    %c0_5 = arith.constant 0 : index
    %c0_6 = arith.constant 0 : index
    %6 = vector.load %arg4[%c0_5, %c0_6] : memref<64x16xf32, #tpu.memory_space<vmem>>, vector<64x16xf32>
    tpu.vector_store %arg4[%c0_5, %c0_6], %5 {strides = array<i32>} : memref<64x16xf32, #tpu.memory_space<vmem>>, vector<64x16xf32>,
    return
  }
  func.func @transform_0(%arg0: i32) -> (i32, i32) {
    %c0_i32 = arith.constant 0 : i32
    %c0_i32_0 = arith.constant 0 : i32
    return %arg0, %c0_i32 : i32, i32
  }
  func.func @transform_1(%arg0: i32) -> (i32, i32) {
    %c0_i32 = arith.constant 0 : i32
    %c0_i32_0 = arith.constant 0 : i32
    %c0_i32_1 = arith.constant 0 : i32
    return %c0_i32, %c0_i32_0 : i32, i32
  }
  func.func @transform_2(%arg0: i32) -> (i32, i32) {
    %c0_i32 = arith.constant 0 : i32
    %c0_i32_0 = arith.constant 0 : i32
    %c0_i32_1 = arith.constant 0 : i32
    return %c0_i32, %c0_i32_0 : i32, i32
  }
  func.func @transform_3(%arg0: i32) -> (i32, i32) {
    %c0_i32 = arith.constant 0 : i32
    %c0_i32_0 = arith.constant 0 : i32
    return %arg0, %c0_i32 : i32, i32
  }
}

</mosaic_0001>

<bundles_post_ra>
// kernel: tpu_custom_call.1
= control target key start
LH: loop header
LB: loop body
LE: loop exit
PB: predicated region body
PF: predicated region fallthrough
CT: control target
= control target key end

     0   :  { %s444_s12 = smov 0   ;;  %s482_s0 = inlined_call_operand.vmem [shape: bf16[256,32], index: 0, kind: input, shape index: {}]   ;;  %s483_s1 = inlined_call_operand.vmem [shape: bf16[16,32], index: 1, kind: input, shape index: {}]   ;;  %s484_s2 = inlined_call_operand.vmem [shape: f32[1,16], index: 2, kind: input, shape index: {}]   ;;  %s485_s3 = inlined_call_operand.vmem [shape: f32[256,16], index: 3, kind: output, shape index: {}]  }
   0x1 LB: > { %s363_s13 = sadd.s32 4294967295, %s422_s12   ;;  %p367_p0 = scmp.ge.s32.totalorder %s422_s12, 1  ;;  %s422_s12 = sphi %s444_s12, %s13_s12  }
   0x2   : > { %p138_p1 = scmp.lt.s32.totalorder %s422_s12, 5 }
   0x4   : > { %p139_p2 = pnand %p367_p0, %p138_p1 }
   0x5   : > { %v411_v0 = vld [vmem:[%s483_s1] sm:$0xff] (!%p139_p2)   ;;  %vm217_vm0 = vcmask (!%p139_p2), 261120   ;;  %s368_s16 = sshll.u32 (!%p139_p2), %s363_s13, 3  ;;  %vm298_vm1 = vcmask (!%p139_p2), 130048  }
   0x6   : > { %142 = sbr.rel (%p139_p2) target bundleno = 236 (0xec), region = 32  ;;  %401 = vmatprep.subr.msk.bf16.mxu0 (!%p139_p2), %vm217_vm0, %v411_v0  ;;  %402 = vmatprep.subr.msk.bf16.mxu1 (!%p139_p2), %vm217_vm0, %v411_v0  ;;  %v231_v1 = vsel (!%p139_p2), %vm217_vm0, %v411_v0, 0  ;;  %p163_p3 = scmp.lt.s32.totalorder (!%p139_p2), %s368_s16, 31  ;;  %v372_v6 = vld [vmem:[%s484_s2] ss:$0 sm:$0xff] (!%p139_p2) }
   0x7   : > { %390 = vmatpush3.bf16.xpose.msra.mxu0 (!%p139_p2), %v231_v1  ;;  %400 = vmatpush3.bf16.xpose.msra.mxu1 (!%p139_p2), %v231_v1 }
   0xd   : > { %s487_s16 = smov (!%p163_p3, %s368_s16), 31 }
   0xe   : > { %s369_s17 = sshll.u32 %s487_s16, 2  ;;  %s371_s21 = sshll.u32 %s487_s16, 3 }
   0xf   : > { %s166_s20 = scalar_lea.vmem %s482_s0, %s369_s17  ;;  %s172_s26 = scalar_lea.vmem %s485_s3, %s371_s21 }
  0x10   : > { %v412_v2 = vld [vmem:[%s166_s20] sm:$0xff]   ;;  %v413_v3 = vld [vmem:[%s166_s20 + $0x10] sm:$0xff]   ;;  %v414_v4 = vld [vmem:[%s166_s20 + $0x8] sm:$0xff]  }
  0x11   : > { %391 = vmatprep.mubr.msk.bf16.mxu0 %vm217_vm0, %v412_v2  ;;  %395 = vmatprep.mubr.msk.bf16.mxu1 %vm217_vm0, %v413_v3  ;;  %v415_v5 = vld [vmem:[%s166_s20 + $0x18] sm:$0xff]  }
  0x12   : > { %392 = vmatmul.mubr.msk.bf16.vlgmr.msra.gmra.mrb[0].mxu0 %vm217_vm0, %v414_v4  ;;  %396 = vmatmul.mubr.msk.bf16.vlgmr.msra.gmra.mrb[0].mxu1 %vm217_vm0, %v415_v5 }
  0xe5   : > { %v393_v7 = vpop.f32.mrb[0].mxu0  ;;  %v397_v9 = vpop.f32.mrb[0].mxu1 }
  0xe6   : > { %v276_v8 = vadd.f32 %v393_v7, %v372_v6  ;;  %v267_v10 = vpop.f32.mrb[1].mxu0  ;;  %v292_v11 = vadd.f32 %v397_v9, %v372_v6  ;;  %v283_v13 = vpop.f32.mrb[1].mxu1 }
  0xe7   : > { %v268_v12 = vadd.f32 %v372_v6, %v267_v10  ;;  %v394_v14 = vpop.f32.mrb[2].mxu0  ;;  %v284_v15 = vadd.f32 %v372_v6, %v283_v13  ;;  %v398_v17 = vpop.f32.mrb[2].mxu1 }
  0xe8   : > { %301 = vst.msk [vmem:[%s172_s26 + $0x10] sm:$0xff] %vm298_vm1, %v276_v8  ;;  %v279_v16 = vadd.f32 %v394_v14, %v372_v6  ;;  %v270_v18 = vpop.f32.mrb[3].mxu0  ;;  %305 = vst.msk [vmem:[%s172_s26 + $0x30] sm:$0xff] %vm298_vm1, %v292_v11  ;;  %v295_v19 = vadd.f32 %v398_v17, %v372_v6  ;;  %v286_v21 = vpop.f32.mrb[3].mxu1 }
  0xe9   : > { %299 = vst.msk [vmem:[%s172_s26] sm:$0xff] %vm298_vm1, %v268_v12  ;;  %v271_v20 = vadd.f32 %v372_v6, %v270_v18  ;;  %303 = vst.msk [vmem:[%s172_s26 + $0x20] sm:$0xff] %vm298_vm1, %v284_v15  ;;  %v287_v22 = vadd.f32 %v372_v6, %v286_v21 }
  0xea   : > { %302 = vst.msk [vmem:[%s172_s26 + $0x18] sm:$0xff] %vm298_vm1, %v279_v16  ;;  %306 = vst.msk [vmem:[%s172_s26 + $0x38] sm:$0xff] %vm298_vm1, %v295_v19 }
  0xeb   : > { %300 = vst.msk [vmem:[%s172_s26 + $0x8] sm:$0xff] %vm298_vm1, %v271_v20  ;;  %304 = vst.msk [vmem:[%s172_s26 + $0x28] sm:$0xff] %vm298_vm1, %v287_v22 }
  0xec PF: > { %s13_s12 = sadd.s32 1, %s422_s12  }
  0xed   : > { %p10_p4 = scmp.ge.s32.totalorder %s13_s12, 6  }
  0xef   :  { %12 = sbr.rel (!%p10_p4) target bundleno = 1 (0x1), region = 62 }

</bundles_post_ra>
